<compile_context>
chip_gen: v5e
topology: v5e:2x2
jax: 0.10.0
libtpu: 0.0.40
codegen_flags: <defaults>
</compile_context>

<pallas_src>
import functools

import jax
import jax.numpy as jnp
from jax import lax
from jax.experimental import pallas as pl
from jax.experimental.pallas import tpu as pltpu

_SUBLANE = 8
_LANE = 128
_MAX_TILE_ROWS = 4096          # bounds per-grid-step latency / output buffer size
_MIN_ROW_STEPS = 4             # prefer >=4 row steps (v7x megacore + pipelining)


def _round_up(x, m):
    return (x + m - 1) // m * m


def _vmem_limit_bytes():
    """Generation-aware scoped-VMEM limit (v7x: 64 MiB/TC, v5e/v6e: 128 MiB)."""
    try:
        cap = int(pltpu.get_tpu_info().vmem_capacity_bytes)
    except Exception:
        cap = 64 * 1024 * 1024                     # conservative: v7x per-TC VMEM
    return min(cap * 3 // 4, 96 * 1024 * 1024)


def _pick_tiles(nc, hw, itemsize, vmem_limit):
    """Pick (tile_rows, tile_hw) so the live working set fits comfortably."""
    budget = int(vmem_limit * 0.55)                # headroom for Mosaic internals
    hw_pad = _round_up(hw, _LANE)

    def working_set(rows, thw_pad):
        in_bytes = 2 * rows * thw_pad * itemsize   # double-buffered input tiles
        tmp_bytes = 2 * rows * thw_pad * 4         # f32 clamp/pow temporaries
        out_bytes = 2 * rows * _LANE * itemsize    # lane-padded (rows, 1) out buffers
        acc_bytes = rows * _LANE * 4               # f32 accumulator scratch
        return in_bytes + tmp_bytes + out_bytes + acc_bytes

    if working_set(_SUBLANE, hw_pad) <= budget:
        # Whole spatial extent per block (single reduction step along k).
        rows = _SUBLANE
        while rows * 2 <= _MAX_TILE_ROWS and working_set(rows * 2, hw_pad) <= budget:
            rows *= 2
        rows_cap = max(_SUBLANE, _round_up(pl.cdiv(nc, _MIN_ROW_STEPS), _SUBLANE))
        rows = max(_SUBLANE, min(rows, rows_cap))
        return rows, hw

    # Huge H*W: tile the spatial axis too (lane-multiple chunks, 8-row tiles).
    tile_hw = _LANE
    while tile_hw * 2 <= hw_pad and working_set(_SUBLANE, tile_hw * 2) <= budget:
        tile_hw *= 2
    return _SUBLANE, tile_hw


def _pow_int(x, n):
    """x ** n for static integer n >= 1 via binary exponentiation (VPU only)."""
    acc = None
    base = x
    e = n
    while e > 0:
        if e & 1:
            acc = base if acc is None else acc * base
        e >>= 1
        if e:
            base = base * base
    return acc


def _accumulate(xp_f32, acc_ref, *, hw, tile_hw, ragged_hw):
    """acc += row-sum of xp, masking out-of-range spatial lanes if ragged."""
    if ragged_hw:
        k = pl.program_id(1)
        lane = lax.broadcasted_iota(jnp.int32, xp_f32.shape, dimension=1)
        valid = (k * tile_hw + lane) < hw
        xp_f32 = jnp.where(valid, xp_f32, 0.0)
    acc_ref[...] += jnp.sum(xp_f32, axis=-1, keepdims=True)


def _gem_kernel_static(x_ref, o_ref, acc_ref, *, eps, p, hw, tile_hw, ragged_hw):
    """p is a static Python number (fast path: integer p -> pure VPU multiplies)."""
    k = pl.program_id(1)

    @pl.when(k == 0)
    def _():
        acc_ref[...] = jnp.zeros_like(acc_ref)

    x = x_ref[...]
    ip = int(p)
    small_int_p = (float(p) == float(ip)) and 1 <= ip <= 16
    # bf16 inputs stay bf16 through the VPU multiply chain; everything else f32.
    if not (small_int_p and x.dtype == jnp.dtype(jnp.bfloat16)):
        x = x.astype(jnp.float32)
    x = jnp.maximum(x, jnp.asarray(eps, x.dtype))        # clamp(min=eps) -> x > 0
    if small_int_p:
        xp = _pow_int(x, ip)                             # e.g. p=3 -> x*x*x
    else:
        xp = jnp.power(x, jnp.asarray(p, x.dtype))
    _accumulate(xp.astype(jnp.float32), acc_ref,
                hw=hw, tile_hw=tile_hw, ragged_hw=ragged_hw)

    @pl.when(k == pl.num_programs(1) - 1)
    def _():
        m = acc_ref[...] * jnp.float32(1.0 / hw)          # mean over H*W
        y = jnp.power(m, jnp.float32(1.0 / float(p)))     # tiny (rows, 1) root
        o_ref[...] = y.astype(o_ref.dtype)


def _gem_kernel_traced(p_ref, x_ref, o_ref, acc_ref, *, eps, hw, tile_hw,
                       ragged_hw, pow_dtype):
    """p is a traced (learnable) scalar parameter, read from SMEM."""
    k = pl.program_id(1)

    @pl.when(k == 0)
    def _():
        acc_ref[...] = jnp.zeros_like(acc_ref)

    p = p_ref[0]                                          # f32 scalar (SMEM)
    x = jnp.maximum(x_ref[...].astype(jnp.float32), jnp.float32(eps))
    if jnp.dtype(pow_dtype) == jnp.dtype(jnp.float32):
        xp = jnp.exp(p * jnp.log(x))                      # f32 EUP path
    else:
        # bf16 EUP path (v6e/v7x): ~2x transcendental throughput; f32 accumulation.
        xb = x.astype(pow_dtype)
        xp = jnp.exp(p.astype(pow_dtype) * jnp.log(xb)).astype(jnp.float32)
    _accumulate(xp, acc_ref, hw=hw, tile_hw=tile_hw, ragged_hw=ragged_hw)

    @pl.when(k == pl.num_programs(1) - 1)
    def _():
        m = acc_ref[...] * jnp.float32(1.0 / hw)
        y = jnp.exp(jnp.log(m) / p)                       # m ** (1/p), tiny (rows, 1)
        o_ref[...] = y.astype(o_ref.dtype)


def _default_pow_dtype():
    """bf16 exp/log doubles EUP throughput on v6e/v7x; older gens keep f32."""
    try:
        kind = jax.devices()[0].device_kind.lower()
    except Exception:
        return jnp.float32
    if any(tag in kind for tag in ("v2", "v3", "v4", "v5")):
        return jnp.float32
    return jnp.bfloat16


def gem_pallas(x, p, eps=1e-6, *, pow_dtype=None, _force_tiles=None):
    """GeM pooling: x (N, C, H, W) -> (N, C, 1, 1) in x.dtype.

    p: Python number (static fast path) or a (1,)/scalar jnp array (traced,
       matches the torch learnable Parameter).
    pow_dtype: dtype for the per-element pow in the traced-p path
       (None -> bf16 on v6e/v7x, f32 on older generations).
    """
    N, C, H, W = x.shape
    NC, HW = N * C, H * W
    xf = x.reshape(NC, HW)

    vmem_limit = _vmem_limit_bytes()
    if _force_tiles is not None:
        tile_rows, tile_hw = _force_tiles
    else:
        tile_rows, tile_hw = _pick_tiles(NC, HW, xf.dtype.itemsize, vmem_limit)
    row_blocks = pl.cdiv(NC, tile_rows)
    hw_blocks = pl.cdiv(HW, tile_hw)
    ragged_hw = (HW % tile_hw) != 0
    grid = (row_blocks, hw_blocks)

    x_spec = pl.BlockSpec((tile_rows, tile_hw), lambda i, k: (i, k))
    o_spec = pl.BlockSpec((tile_rows, 1), lambda i, k: (i, 0))   # resident across k
    out_shape = jax.ShapeDtypeStruct((NC, 1), x.dtype)
    scratch = [pltpu.VMEM((tile_rows, 1), jnp.float32)]          # f32 row-sum acc

    compiler_params = pltpu.CompilerParams(
        dimension_semantics=("parallel", "arbitrary"),
        vmem_limit_bytes=vmem_limit,
    )

    n_elems = NC * HW
    io_bytes = n_elems * xf.dtype.itemsize + NC * xf.dtype.itemsize
    static_p = isinstance(p, (int, float))

    if static_p:
        cost = pl.CostEstimate(flops=5 * n_elems, transcendentals=2 * NC,
                               bytes_accessed=io_bytes)
        out = pl.pallas_call(
            functools.partial(_gem_kernel_static, eps=eps, p=float(p),
                              hw=HW, tile_hw=tile_hw, ragged_hw=ragged_hw),
            out_shape=out_shape,
            grid_spec=pltpu.PrefetchScalarGridSpec(
                num_scalar_prefetch=0,
                grid=grid,
                in_specs=[x_spec],
                out_specs=o_spec,
                scratch_shapes=scratch,
            ),
            compiler_params=compiler_params,
            cost_estimate=cost,
        )(xf)
    else:
        auto_pow = pow_dtype is None
        pdt = _default_pow_dtype() if auto_pow else pow_dtype
        p_arr = jnp.asarray(p, jnp.float32).reshape(1)
        cost = pl.CostEstimate(flops=3 * n_elems,
                               transcendentals=2 * n_elems + 2 * NC,
                               bytes_accessed=io_bytes)

        def run_traced(pdt_):
            return pl.pallas_call(
                functools.partial(_gem_kernel_traced, eps=eps, hw=HW,
                                  tile_hw=tile_hw, ragged_hw=ragged_hw,
                                  pow_dtype=pdt_),
                out_shape=out_shape,
                grid_spec=pltpu.PrefetchScalarGridSpec(
                    num_scalar_prefetch=0,
                    grid=grid,
                    in_specs=[
                        pl.BlockSpec(memory_space=pltpu.MemorySpace.SMEM),  # p scalar
                        x_spec,
                    ],
                    out_specs=o_spec,
                    scratch_shapes=scratch,
                ),
                compiler_params=compiler_params,
                cost_estimate=cost,
            )(p_arr, xf)

        try:
            out = run_traced(pdt)
        except Exception:
            # Auto-selected bf16 transcendentals unavailable on this gen -> f32.
            if auto_pow and jnp.dtype(pdt) != jnp.dtype(jnp.float32):
                out = run_traced(jnp.float32)
            else:
                raise

    return out.reshape(N, C, 1, 1)


def gem_reference(x, p, eps=1e-6):
    """Pure-JAX reference matching torch's gem()."""
    p0 = jnp.asarray(p, jnp.float32).reshape(-1)[0]
    xp = jnp.power(jnp.maximum(x.astype(jnp.float32), eps), p0)
    m = jnp.mean(xp, axis=(-2, -1), keepdims=True)
    return jnp.power(m, 1.0 / p0)


if __name__ == "__main__":
    key = jax.random.PRNGKey(0)
    eps = 1e-6

    # Small shape consistent with the module's forward: (N, C, H, W).
    N, C, H, W = 2, 4, 16, 16
    x = jax.random.normal(key, (N, C, H, W), dtype=jnp.float32)
    p_param = jnp.ones((1,), dtype=jnp.float32) * 3.0     # GeM.__init__: ones(1) * p

    y_ref = gem_reference(x, p_param, eps)

    # 1) Static-p fast path (p=3 -> binary-exponentiation VPU multiplies).
    y_static = gem_pallas(x, 3.0, eps)
    jax.block_until_ready(y_static)
    assert y_static.shape == (N, C, 1, 1)
    assert jnp.allclose(y_static, y_ref, rtol=1e-4, atol=1e-5), (
        f"static path max abs err {jnp.max(jnp.abs(y_static - y_ref))}")

    # 2) Traced learnable-p path, f32 transcendentals (reference precision).
    y_traced = gem_pallas(x, p_param, eps, pow_dtype=jnp.float32)
    jax.block_until_ready(y_traced)
    assert y_traced.shape == (N, C, 1, 1)
    assert jnp.allclose(y_traced, y_ref, rtol=1e-4, atol=1e-5), (
        f"traced f32 path max abs err {jnp.max(jnp.abs(y_traced - y_ref))}")

    # 3) Traced path, auto pow dtype (bf16 EUP on v6e/v7x, f32 on older gens).
    y_auto = gem_pallas(x, p_param, eps)
    jax.block_until_ready(y_auto)
    assert jnp.allclose(y_auto, y_ref, rtol=5e-2, atol=1e-3), (
        f"traced auto path max abs err {jnp.max(jnp.abs(y_auto - y_ref))}")

    # 4) Ragged rows + forced spatial tiling: exercises the 2-D reduction grid,
    #    the k==0 / k==last accumulator phases and the ragged-lane masking.
    N2, C2, H2, W2 = 1, 3, 20, 20                          # NC=3 (ragged), HW=400
    x2 = jax.random.normal(jax.random.PRNGKey(1), (N2, C2, H2, W2), jnp.float32)
    y2_ref = gem_reference(x2, p_param, eps)
    y2_static = gem_pallas(x2, 3.0, eps, _force_tiles=(8, 128))
    jax.block_until_ready(y2_static)
    assert jnp.allclose(y2_static, y2_ref, rtol=1e-4, atol=1e-5), (
        f"tiled static max abs err {jnp.max(jnp.abs(y2_static - y2_ref))}")
    y2_traced = gem_pallas(x2, p_param, eps, pow_dtype=jnp.float32,
                           _force_tiles=(8, 128))
    jax.block_until_ready(y2_traced)
    assert jnp.allclose(y2_traced, y2_ref, rtol=1e-4, atol=1e-5), (
        f"tiled traced max abs err {jnp.max(jnp.abs(y2_traced - y2_ref))}")

    # 5) bf16 inputs stay bf16 through the static multiply chain (f32 row sums).
    x_bf = x.astype(jnp.bfloat16)
    y_bf = gem_pallas(x_bf, 3.0, eps)
    jax.block_until_ready(y_bf)
    y_bf_ref = gem_reference(x_bf.astype(jnp.float32), p_param, eps)
    assert y_bf.dtype == jnp.bfloat16
    assert jnp.allclose(y_bf.astype(jnp.float32), y_bf_ref, rtol=3e-2, atol=1e-3), (
        f"bf16 static max abs err "
        f"{jnp.max(jnp.abs(y_bf.astype(jnp.float32) - y_bf_ref))}")

    print("KERNEL_OK")
</pallas_src>

<mosaic_0001>
module attributes {stable_mosaic.version = 11 : i64} {
  func.func @_gem_kernel_static(%arg0: i32, %arg1: i32, %arg2: memref<8x256xf32, #tpu.memory_space<vmem>>, %arg3: memref<8x1xf32, #tpu.memory_space<vmem>>, %arg4: memref<8x1xf32, #tpu.memory_space<vmem>>) attributes {dimension_semantics = [#tpu.dimension_semantics<parallel>, #tpu.dimension_semantics<arbitrary>], iteration_bounds = array<i64: 1, 1>, scalar_prefetch = 0 : i64, scratch_operands = 1 : i64, tpu.core_type = #tpu.core_type<tc>, window_params = [{transform_indices = @transform_0, window_bounds = array<i64: 8, 256>}, {transform_indices = @transform_1, window_bounds = array<i64: 8, 1>}]} {
    %c0_i32 = arith.constant 0 : i32
    %0 = arith.cmpi eq, %arg1, %c0_i32 : i32
    %1 = arith.extui %0 : i1 to i32
    %c0_i32_0 = arith.constant 0 : i32
    %2 = arith.cmpi ne, %1, %c0_i32_0 : i32
    scf.if %2 {
      %cst_9 = arith.constant 0.000000e+00 : f32
      %16 = vector.broadcast %cst_9 : f32 to vector<8x1xf32>
      %c0_10 = arith.constant 0 : index
      %c0_11 = arith.constant 0 : index
      %17 = vector.load %arg4[%c0_10, %c0_11] : memref<8x1xf32, #tpu.memory_space<vmem>>, vector<8x1xf32>
      tpu.vector_store %arg4[%c0_10, %c0_11], %16 {strides = array<i32>} : memref<8x1xf32, #tpu.memory_space<vmem>>, vector<8x1xf32>,
    } else {
    }
    %c0 = arith.constant 0 : index
    %c0_1 = arith.constant 0 : index
    %3 = vector.load %arg2[%c0, %c0_1] : memref<8x256xf32, #tpu.memory_space<vmem>>, vector<8x256xf32>
    %cst = arith.constant 9.99999997E-7 : f32
    %4 = vector.broadcast %cst : f32 to vector<8x256xf32>
    %5 = arith.maximumf %3, %4 : vector<8x256xf32>
    %6 = arith.mulf %5, %5 : vector<8x256xf32>
    %7 = arith.mulf %5, %6 : vector<8x256xf32>
    %c0_2 = arith.constant 0 : index
    %c0_3 = arith.constant 0 : index
    %8 = vector.load %arg4[%c0_2, %c0_3] : memref<8x1xf32, #tpu.memory_space<vmem>>, vector<8x1xf32>
    %cst_4 = arith.constant dense<0.000000e+00> : vector<8xf32>
    %9 = vector.multi_reduction <add>, %7, %cst_4 [1] : vector<8x256xf32> to vector<8xf32>
    %10 = vector.shape_cast %9 : vector<8xf32> to vector<8x1xf32>
    %11 = arith.addf %8, %10 : vector<8x1xf32>
    %c0_5 = arith.constant 0 : index
    %c0_6 = arith.constant 0 : index
    %12 = vector.load %arg4[%c0_5, %c0_6] : memref<8x1xf32, #tpu.memory_space<vmem>>, vector<8x1xf32>
    tpu.vector_store %arg4[%c0_5, %c0_6], %11 {strides = array<i32>} : memref<8x1xf32, #tpu.memory_space<vmem>>, vector<8x1xf32>,
    %c0_i32_7 = arith.constant 0 : i32
    %13 = arith.cmpi eq, %arg1, %c0_i32_7 : i32
    %14 = arith.extui %13 : i1 to i32
    %c0_i32_8 = arith.constant 0 : i32
    %15 = arith.cmpi ne, %14, %c0_i32_8 : i32
    scf.if %15 {
      %c0_9 = arith.constant 0 : index
      %c0_10 = arith.constant 0 : index
      %16 = vector.load %arg4[%c0_9, %c0_10] : memref<8x1xf32, #tpu.memory_space<vmem>>, vector<8x1xf32>
      %cst_11 = arith.constant 3.906250e-03 : f32
      %17 = vector.broadcast %cst_11 : f32 to vector<8x1xf32>
      %18 = arith.mulf %16, %17 : vector<8x1xf32>
      %cst_12 = arith.constant 0.333333343 : f32
      %19 = vector.broadcast %cst_12 : f32 to vector<8x1xf32>
      %20 = math.powf %18, %19 : vector<8x1xf32>
      %c0_13 = arith.constant 0 : index
      %c0_14 = arith.constant 0 : index
      %21 = vector.load %arg3[%c0_13, %c0_14] : memref<8x1xf32, #tpu.memory_space<vmem>>, vector<8x1xf32>
      tpu.vector_store %arg3[%c0_13, %c0_14], %20 {strides = array<i32>} : memref<8x1xf32, #tpu.memory_space<vmem>>, vector<8x1xf32>,
    } else {
    }
    return
  }
  func.func @transform_0(%arg0: i32, %arg1: i32) -> (i32, i32) {
    %c0_i32 = arith.constant 0 : i32
    return %arg0, %arg1 : i32, i32
  }
  func.func @transform_1(%arg0: i32, %arg1: i32) -> (i32, i32) {
    %c0_i32 = arith.constant 0 : i32
    %c0_i32_0 = arith.constant 0 : i32
    return %arg0, %c0_i32 : i32, i32
  }
}

</mosaic_0001>

<bundles_post_ra>
// kernel: tpu_custom_call.1
= control target key start
LH: loop header
LB: loop body
LE: loop exit
PB: predicated region body
PF: predicated region fallthrough
CT: control target
= control target key end

     0   :  { %6 = vsyncpa [#allocation4], 0  ;;  %s111_s9 = smov [#allocation3]   ;;  %s132_s0 = inlined_call_operand.hbm [shape: f32[8,256], index: 0, kind: input, shape index: {}]   ;;  %s133_s1 = inlined_call_operand.vmem [shape: f32[8,1], index: 1, kind: output, shape index: {}]  }
   0x1   :  { %s12_s8 = sshll.u32 %s132_s0, 4  ;;  %s14_s10 = sshll.u32 %s111_s9, 4  ;;  %s13_s8 = int_to_ptr.hbm [resolvable:$true] %s12_s8  ;;  %s15_s10 = int_to_ptr.vmem [resolvable:$true] %s14_s10 }
   0x2   :  { %17 = dma.hbm_to_vmem [thread:$0]  %s13_s8, 256, %s15_s10, [#allocation4]  }
   0x3   :  { %109 = dma.done.wait [#allocation4], 256  }
   0x4   :  { %110 = vsyncadd [#allocation4], 4294967040  ;;  %vm26_vm0 = vcmask 7168   ;;  %v112_v0 = vmov 0.0   ;;  %v28_v1 = vld [vmem:[#allocation3] sm:$0xff]  ;;  %v29_v2 = vld [vmem:[#allocation3 + $0x8] sm:$0xff] }
   0x5   :  { %27 = vst.msk [vmem:[#allocation2] sm:$0xff] %vm26_vm0, %v112_v0  ;;  %v30_v3 = vmax.f32 %v28_v1, 1e-06  ;;  %v31_v4 = vmax.f32 %v29_v2, 1e-06 }
   0x7   :  { %v32_v5 = vmul.f32 %v30_v3, %v30_v3  ;;  %v33_v6 = vmul.f32 %v31_v4, %v31_v4 }
   0x9   :  { %v34_v7 = vmul.f32 %v32_v5, %v30_v3  ;;  %v35_v8 = vmul.f32 %v33_v6, %v31_v4 }
   0xb   :  { %v37_v9 = vadd.f32 %v35_v8, %v34_v7 }
   0xc   :  { %v36_v10 = vld [vmem:[#allocation2] sm:$0xff] }
   0xd   :  { %38 = vadd.xlane.f32.xlu0 %v37_v9 }
  0x80   :  { %v39_v11 = vpop.xlane.xlu0 %38 }
  0x81   :  { %v40_v12 = vadd.f32 %v39_v11, %v36_v10 }
  0x83   :  { %42 = vst.msk [vmem:[#allocation2] sm:$0xff] %vm26_vm0, %v40_v12 }
  0x8a   :  { %v46_v13 = vld [vmem:[#allocation2] sm:$0xff] }
  0x8b   :  { %v47_v14 = vmul.f32 0.00390625, %v46_v13 }
  0x8d   :  { %v57_v15 = vand.u32 2147483647, %v47_v14  ;;  %v74_v27 = vand.u32 2147483648, %v47_v14  ;;  %vm56_vm3 = vcmp.lt.f32.partialorder %v47_v14, 0.0  ;;  %vm55_vm4 = vcmp.eq.f32.partialorder %v47_v14, 0.0 }
  0x8f   :  { %81 = vlog2.f32 %v57_v15  ;;  %vm71_vm1 = vweird.f32 %v57_v15  ;;  %vm73_vm2 = vcmp.eq.f32.partialorder %v57_v15, 0.0  ;;  %vm58_vm5 = vcmp.eq.f32.partialorder %v57_v15, inf }
  0x95   :  { %v82_v16 = vpop.eup %81 }
  0x96   :  { %v61_v17 = vmul.f32 -0.33333334, %v82_v16 }
  0x98   :  { %83 = vpow2.f32 %v61_v17 }
  0x9e   :  { %v84_v18 = vpop.eup %83 }
  0x9f   :  { %v63_v19 = vmul.f32 %v84_v18, %v84_v18 }
  0xa1   :  { %v64_v20 = vmul.f32 %v63_v19, %v57_v15 }
  0xa3   :  { %v65_v21 = vmul.f32 %v64_v20, %v63_v19 }
  0xa5   :  { %v66_v22 = vsub.f32 %v65_v21, %v84_v18 }
  0xa7   :  { %v67_v23 = vmul.f32 -0.33333334, %v66_v22 }
  0xa9   :  { %v68_v24 = vadd.f32 %v84_v18, %v67_v23 }
  0xab   :  { %v69_v25 = vmul.f32 %v68_v24, %v47_v14 }
  0xad   :  { %v70_v26 = vmul.f32 %v69_v25, %v68_v24 }
  0xaf   :  { %v72_v28 = vsel %vm71_vm1, %v47_v14, %v70_v26 }
  0xb0   :  { %v75_v29 = vsel %vm73_vm2, %v74_v27, %v72_v28 }
  0xb1   :  { %v76_v30 = vsel %vm56_vm3, nan, %v75_v29 }
  0xb2   :  { %v77_v31 = vsel %vm55_vm4, 0.0, %v76_v30 }
  0xb3   :  { %v78_v32 = vsel %vm58_vm5, inf, %v77_v31 }
  0xb4   :  { %49 = vst.msk [vmem:[%s133_s1] sm:$0xff] %vm26_vm0, %v78_v32 }
  0xb5   :  { %54 = vsyncpa [#allocation4], 1 }

</bundles_post_ra>
